<compile_context>
chip_gen: v6e
topology: v6e:2x2x1
jax: 0.10.0
libtpu: 0.0.40
codegen_flags: <defaults>
</compile_context>

<pallas_src>
import functools

import jax
import jax.numpy as jnp
from jax.experimental import pallas as pl
from jax.experimental.pallas import tpu as pltpu


def _lsq_quant(w, s, thd_neg=-2.0, thd_pos=1.0):
    # 2-bit LSQ forward value: thd_neg = -2**(bit-1) = -2, thd_pos = 2**(bit-1)-1 = 1
    return jnp.round(jnp.clip(w / s, thd_neg, thd_pos)) * s


def mlp_kernel(s_ref, xt_ref, w1_ref, b1_ref, w2s_ref, b2_ref, ot_ref):
    # s_ref: SMEM (1,) scalar-prefetch = [1/s_act]
    inv_sq = s_ref[0]

    # linear1 (transposed): qW1 (H, F_pad) @ x^T (F_pad, tb) -> h^T (H, tb)
    h = jnp.dot(w1_ref[...], xt_ref[...], preferred_element_type=jnp.float32)
    h = jnp.maximum(h + b1_ref[...], 0.0)          # b1 (H,1) broadcast over lanes

    # activation LSQ quant (2-bit) integer code; scale s_act is folded into qW2
    hq = jnp.round(jnp.clip(h * inv_sq, -2.0, 1.0))

    # linear2 (transposed): (s_act*qW2) (O_pad, H) @ hq (H, tb) -> out^T (O_pad, tb)
    out = jnp.dot(w2s_ref[...], hq, preferred_element_type=jnp.float32)
    ot_ref[...] = (out + b2_ref[...]).astype(ot_ref.dtype)


def mlp_forward(x, w1, b1, w2, b2, s1, s2, s_act, *, block_batch=1024):
    B, F = x.shape
    H = w1.shape[0]
    O = w2.shape[0]

    # --- trace-time prep (fused into the surrounding XLA graph under jit) ---
    # Quantize weights once (STE forward value); keep natural (out, in) layout.
    qw1 = _lsq_quant(w1, s1)                                   # (H, F)
    qw2s = _lsq_quant(w2, s2) * jnp.asarray(s_act, jnp.float32)  # (O, H), s_act folded

    # Pad in_features to a multiple of 8 sublanes (zero columns contribute 0).
    F_pad = max(8, pl.cdiv(F, 8) * 8)
    qw1p = jnp.pad(qw1, ((0, 0), (0, F_pad - F)))              # (H, F_pad)

    # Pad out_features to 8 sublanes for the transposed (O_pad, tb) output.
    O_pad = max(8, pl.cdiv(O, 8) * 8)
    qw2p = jnp.pad(qw2s, ((0, O_pad - O), (0, 0)))             # (O_pad, H)
    b2p = jnp.pad(b2, (0, O_pad - O)).reshape(O_pad, 1)        # (O_pad, 1)
    b1p = b1.reshape(H, 1)                                     # (H, 1)

    # Batch tile: multiple of 128 lanes, capped by block_batch, and sized so
    # medium batches give >= 2 grid steps (keeps both v7x TensorCores busy).
    bb = max(128, (block_batch // 128) * 128)
    tb = max(128, min(bb, pl.cdiv(pl.cdiv(B, 2), 128) * 128))
    b_pad = pl.cdiv(B, tb) * tb

    # x^T with batch on lanes (tiny pad: F*(b_pad-B) + B*(F_pad-F) elements).
    xt = jnp.pad(x, ((0, b_pad - B), (0, F_pad - F))).T        # (F_pad, b_pad)

    # Activation-quant reciprocal (no in-kernel divide).
    scalars = (1.0 / jnp.asarray(s_act, jnp.float32)).reshape((1,))

    grid = (b_pad // tb,)
    out_t = pl.pallas_call(
        mlp_kernel,
        out_shape=jax.ShapeDtypeStruct((O_pad, b_pad), jnp.float32),
        grid_spec=pltpu.PrefetchScalarGridSpec(
            num_scalar_prefetch=1,
            grid=grid,
            in_specs=[
                pl.BlockSpec((F_pad, tb), lambda i, s: (0, i)),     # x^T streamed
                pl.BlockSpec((H, F_pad), lambda i, s: (0, 0)),      # qW1   (resident)
                pl.BlockSpec((H, 1), lambda i, s: (0, 0)),          # b1    (resident)
                pl.BlockSpec((O_pad, H), lambda i, s: (0, 0)),      # s*qW2 (resident)
                pl.BlockSpec((O_pad, 1), lambda i, s: (0, 0)),      # b2    (resident)
            ],
            out_specs=pl.BlockSpec((O_pad, tb), lambda i, s: (0, i)),
        ),
        compiler_params=pltpu.CompilerParams(
            dimension_semantics=("parallel",),                      # 2 TCs on v7x
        ),
    )(scalars, xt, qw1p, b1p, qw2p, b2p)

    # out_features = 3 > 1 for the wine dataset, so no .view(-1) branch.
    # TODO(synk): sampling=True path (x * self.predWeight) not implemented here.
    return out_t[:O, :B].T


def jax_reference(x, w1, b1, w2, b2, s1, s2, s_act):
    qw1 = _lsq_quant(w1, s1)
    qw2 = _lsq_quant(w2, s2)
    h = x @ qw1.T + b1
    h = jnp.maximum(h, 0.0)
    h = _lsq_quant(h, s_act)
    return h @ qw2.T + b2


if __name__ == "__main__":
    # Small shapes: wine dataset -> in_features=13, out_features=3; hidden=32.
    in_features = 13
    hidden = 32
    out_features = 3

    key = jax.random.PRNGKey(0)
    k1, k2, k3, k4, k5, k6 = jax.random.split(key, 6)

    # Deterministic init mimicking nn.Linear default U(-1/sqrt(fan_in), 1/sqrt(fan_in)).
    bound1 = 1.0 / (in_features ** 0.5)
    bound2 = 1.0 / (hidden ** 0.5)
    w1 = jax.random.uniform(k1, (hidden, in_features), jnp.float32, -bound1, bound1)
    b1 = jax.random.uniform(k2, (hidden,), jnp.float32, -bound1, bound1)
    w2 = jax.random.uniform(k3, (out_features, hidden), jnp.float32, -bound2, bound2)
    b2 = jax.random.uniform(k4, (out_features,), jnp.float32, -bound2, bound2)

    # LSQ step sizes: quant1/quant2 init_from(weight) -> 2*mean|W|; activation s = 1.0.
    s1 = 2.0 * jnp.mean(jnp.abs(w1))
    s2 = 2.0 * jnp.mean(jnp.abs(w2))
    s_act = jnp.float32(1.0)

    mlp_fn = jax.jit(functools.partial(mlp_forward), static_argnames=("block_batch",))

    # 1) tiny batch (single grid step)
    batch = 4
    x = jax.random.normal(k5, (batch, in_features), jnp.float32)
    out = jax.block_until_ready(mlp_fn(x, w1, b1, w2, b2, s1, s2, s_act))
    ref = jax_reference(x, w1, b1, w2, b2, s1, s2, s_act)
    assert out.shape == (batch, out_features)
    assert jnp.allclose(out, ref, atol=1e-5, rtol=1e-5), "mismatch vs reference (B=4)"

    # 2) larger batch exercising the batch grid + tail padding (multiple tiles)
    batch2 = 300
    x2 = jax.random.normal(k6, (batch2, in_features), jnp.float32)
    out2 = jax.block_until_ready(
        mlp_fn(x2, w1, b1, w2, b2, s1, s2, s_act, block_batch=128))
    ref2 = jax_reference(x2, w1, b1, w2, b2, s1, s2, s_act)
    assert out2.shape == (batch2, out_features)
    assert jnp.allclose(out2, ref2, atol=1e-5, rtol=1e-5), "mismatch vs reference (B=300)"

    print("KERNEL_OK")
</pallas_src>

<mosaic_0001>
module attributes {stable_mosaic.version = 11 : i64} {
  func.func @mlp_kernel(%arg0: i32, %arg1: memref<1xf32, #tpu.memory_space<smem>>, %arg2: memref<16x128xf32, #tpu.memory_space<vmem>>, %arg3: memref<32x16xf32, #tpu.memory_space<vmem>>, %arg4: memref<32x1xf32, #tpu.memory_space<vmem>>, %arg5: memref<8x32xf32, #tpu.memory_space<vmem>>, %arg6: memref<8x1xf32, #tpu.memory_space<vmem>>, %arg7: memref<8x128xf32, #tpu.memory_space<vmem>>) attributes {dimension_semantics = [#tpu.dimension_semantics<parallel>], iteration_bounds = array<i64: 1>, scalar_prefetch = 1 : i64, scratch_operands = 0 : i64, tpu.core_type = #tpu.core_type<tc>, window_params = [{transform_indices = @transform_0, window_bounds = array<i64: 16, 128>}, {pipeline_mode = #tpu.pipeline_mode<synchronous>, transform_indices = @transform_1, window_bounds = array<i64: 32, 16>}, {pipeline_mode = #tpu.pipeline_mode<synchronous>, transform_indices = @transform_2, window_bounds = array<i64: 32, 1>}, {pipeline_mode = #tpu.pipeline_mode<synchronous>, transform_indices = @transform_3, window_bounds = array<i64: 8, 32>}, {pipeline_mode = #tpu.pipeline_mode<synchronous>, transform_indices = @transform_4, window_bounds = array<i64: 8, 1>}, {transform_indices = @transform_5, window_bounds = array<i64: 8, 128>}]} {
    %c0 = arith.constant 0 : index
    %0 = memref.load %arg1[%c0] : memref<1xf32, #tpu.memory_space<smem>>
    %c0_0 = arith.constant 0 : index
    %c0_1 = arith.constant 0 : index
    %1 = vector.load %arg3[%c0_0, %c0_1] : memref<32x16xf32, #tpu.memory_space<vmem>>, vector<32x16xf32>
    %c0_2 = arith.constant 0 : index
    %c0_3 = arith.constant 0 : index
    %2 = vector.load %arg2[%c0_2, %c0_3] : memref<16x128xf32, #tpu.memory_space<vmem>>, vector<16x128xf32>
    %cst = arith.constant dense<0.000000e+00> : vector<32x128xf32>
    %3 = tpu.matmul %1, %2, %cst {dimension_numbers = #tpu.dot_dimension_numbers<[1], [0], [0], [1], [0, 0, 1, 1], [], []>} : vector<32x16xf32>, vector<16x128xf32>, vector<32x128xf32> -> vector<32x128xf32>
    %c0_4 = arith.constant 0 : index
    %c0_5 = arith.constant 0 : index
    %4 = vector.load %arg4[%c0_4, %c0_5] : memref<32x1xf32, #tpu.memory_space<vmem>>, vector<32x1xf32>
    %5 = vector.broadcast %4 : vector<32x1xf32> to vector<32x128xf32>
    %6 = arith.addf %3, %5 : vector<32x128xf32>
    %cst_6 = arith.constant 0.000000e+00 : f32
    %7 = vector.broadcast %cst_6 : f32 to vector<32x128xf32>
    %8 = arith.maximumf %6, %7 : vector<32x128xf32>
    %9 = vector.broadcast %0 : f32 to vector<32x128xf32>
    %10 = arith.mulf %8, %9 : vector<32x128xf32>
    %cst_7 = arith.constant -2.000000e+00 : f32
    %cst_8 = arith.constant 1.000000e+00 : f32
    %11 = vector.broadcast %cst_7 : f32 to vector<32x128xf32>
    %12 = arith.maximumf %11, %10 : vector<32x128xf32>
    %13 = vector.broadcast %cst_8 : f32 to vector<32x128xf32>
    %14 = arith.minimumf %13, %12 : vector<32x128xf32>
    %15 = math.roundeven %14 : vector<32x128xf32>
    %c0_9 = arith.constant 0 : index
    %c0_10 = arith.constant 0 : index
    %16 = vector.load %arg5[%c0_9, %c0_10] : memref<8x32xf32, #tpu.memory_space<vmem>>, vector<8x32xf32>
    %cst_11 = arith.constant dense<0.000000e+00> : vector<8x128xf32>
    %17 = tpu.matmul %16, %15, %cst_11 {dimension_numbers = #tpu.dot_dimension_numbers<[1], [0], [0], [1], [0, 0, 1, 1], [], []>} : vector<8x32xf32>, vector<32x128xf32>, vector<8x128xf32> -> vector<8x128xf32>
    %c0_12 = arith.constant 0 : index
    %c0_13 = arith.constant 0 : index
    %18 = vector.load %arg6[%c0_12, %c0_13] : memref<8x1xf32, #tpu.memory_space<vmem>>, vector<8x1xf32>
    %19 = vector.broadcast %18 : vector<8x1xf32> to vector<8x128xf32>
    %20 = arith.addf %17, %19 : vector<8x128xf32>
    %c0_14 = arith.constant 0 : index
    %c0_15 = arith.constant 0 : index
    %21 = vector.load %arg7[%c0_14, %c0_15] : memref<8x128xf32, #tpu.memory_space<vmem>>, vector<8x128xf32>
    tpu.vector_store %arg7[%c0_14, %c0_15], %20 {strides = array<i32>} : memref<8x128xf32, #tpu.memory_space<vmem>>, vector<8x128xf32>,
    return
  }
  func.func @transform_0(%arg0: i32, %arg1: memref<1xf32, #tpu.memory_space<smem>>) -> (i32, i32) {
    %c0_i32 = arith.constant 0 : i32
    %c0_i32_0 = arith.constant 0 : i32
    return %c0_i32, %arg0 : i32, i32
  }
  func.func @transform_1(%arg0: i32, %arg1: memref<1xf32, #tpu.memory_space<smem>>) -> (i32, i32) {
    %c0_i32 = arith.constant 0 : i32
    %c0_i32_0 = arith.constant 0 : i32
    %c0_i32_1 = arith.constant 0 : i32
    return %c0_i32, %c0_i32_0 : i32, i32
  }
  func.func @transform_2(%arg0: i32, %arg1: memref<1xf32, #tpu.memory_space<smem>>) -> (i32, i32) {
    %c0_i32 = arith.constant 0 : i32
    %c0_i32_0 = arith.constant 0 : i32
    %c0_i32_1 = arith.constant 0 : i32
    return %c0_i32, %c0_i32_0 : i32, i32
  }
  func.func @transform_3(%arg0: i32, %arg1: memref<1xf32, #tpu.memory_space<smem>>) -> (i32, i32) {
    %c0_i32 = arith.constant 0 : i32
    %c0_i32_0 = arith.constant 0 : i32
    %c0_i32_1 = arith.constant 0 : i32
    return %c0_i32, %c0_i32_0 : i32, i32
  }
  func.func @transform_4(%arg0: i32, %arg1: memref<1xf32, #tpu.memory_space<smem>>) -> (i32, i32) {
    %c0_i32 = arith.constant 0 : i32
    %c0_i32_0 = arith.constant 0 : i32
    %c0_i32_1 = arith.constant 0 : i32
    return %c0_i32, %c0_i32_0 : i32, i32
  }
  func.func @transform_5(%arg0: i32, %arg1: memref<1xf32, #tpu.memory_space<smem>>) -> (i32, i32) {
    %c0_i32 = arith.constant 0 : i32
    %c0_i32_0 = arith.constant 0 : i32
    return %c0_i32, %arg0 : i32, i32
  }
}

</mosaic_0001>

<bundles_post_ra>
// kernel: mlp_forward.1
= control target key start
LH: loop header
LB: loop body
LE: loop exit
PB: predicated region body
PF: predicated region fallthrough
CT: control target
= control target key end

     0   :  { %vm53_vm0 = vcmask 130048   ;;  %v332_v3 = vmov 0   ;;  %v333_v12 = vmov 0.0   ;;  %vm334_vm1 = vmmov 0   ;;  %s421_s1 = inlined_call_operand.vmem [shape: f32[16,128], index: 1, kind: input, shape index: {}]   ;;  %s422_s2 = inlined_call_operand.vmem [shape: f32[32,16], index: 2, kind: input, shape index: {}]   ;;  %s423_s3 = inlined_call_operand.vmem [shape: f32[32,1], index: 3, kind: input, shape index: {}]   ;;  %s424_s5 = inlined_call_operand.vmem [shape: f32[8,1], index: 5, kind: input, shape index: {}]   ;;  %s425_s0 = inlined_call_operand.<no memory space> [shape: f32[1], index: 0, kind: input, shape index: {}]   ;;  %s426_s4 = inlined_call_operand.vmem [shape: f32[8,32], index: 4, kind: input, shape index: {}]   ;;  %s427_s6 = inlined_call_operand.vmem [shape: f32[8,128], index: 6, kind: output, shape index: {}]  }
   0x1   :  { %v28_v0 = vld [vmem:[%s421_s1 + $0x8] sm:$0xff]  ;;  %v27_v1 = vld [vmem:[%s421_s1] sm:$0xff]  ;;  %330 = vset.pattern.permute.xlu0 %v332_v3  ;;  %331 = vset.pattern.permute.xlu1 %v332_v3  ;;  %v32_v5 = vld [vmem:[%s423_s3 + $0x18] sm:$0xff]  ;;  %v155_v18 = vstv %s425_s0  ;;  %vm179_vm6 = vcmask 261120  }
   0x2   :  { %v23_v2 = vld [vmem:[%s422_s2] sm:$0xff]  ;;  %274 = vmatprep.subr.mxu0 %v28_v0  ;;  %v24_v4 = vld [vmem:[%s422_s2 + $0x8] sm:$0xff]  ;;  %v25_v7 = vld [vmem:[%s422_s2 + $0x10] sm:$0xff]  ;;  %50 = vperm.xlu0 %330, %v32_v5  }
   0x3   :  { %278 = vmatprep.mubr.msk.f32.mxu0 %vm53_vm0, %v23_v2  ;;  %275 = vmatpush3.msra.mxu0 %v28_v0  ;;  %v30_v6 = vld [vmem:[%s423_s3 + $0x8] sm:$0xff]  ;;  %v31_v8 = vld [vmem:[%s423_s3 + $0x10] sm:$0xff]  ;;  %v29_v9 = vld [vmem:[%s423_s3] sm:$0xff] }
   0x4   :  { %276 = vmatprep.subr.mxu0 %v27_v1  ;;  %40 = vperm.xlu1 %331, %v30_v6   ;;  %v26_v10 = vld [vmem:[%s422_s2 + $0x18] sm:$0xff]  ;;  %v173_v11 = vld [vmem:[%s424_s5] sm:$0xff] }
   0x5   :  { %277 = vmatpush3.msra.mxu0 %v27_v1  ;;  %284 = vmatprep.subr.mxu1 %v333_v12  ;;  %v172_v5 = vld [vmem:[%s426_s4] sm:$0xff] }
   0x6   :  { %279 = vmatmul.mubr.msk.f32.vlgmr.msra.gmra.mxu0 %vm53_vm0, %v24_v4  ;;  %45 = vperm.xlu0 %330, %v31_v8  }
   0x7   :  { %281 = vmatprep.mubr.msk.f32.mxu0 %vm53_vm0, %v25_v7  ;;  %292 = vmatprep.mubr.msk.f32.mxu1 %vm334_vm1, %v333_v12 }
   0x8   :  { %35 = vperm.xlu1 %331, %v29_v9  }
   0xa   :  { %282 = vmatmul.mubr.msk.f32.gmra.mxu0 %vm53_vm0, %v26_v10  ;;  %176 = vperm.xlu0 %330, %v173_v11  }
  0x7d   :  { %v51_v14 = vpop.permute.xlu0 %50 }
  0x7f   :  { %v41_v13 = vpop.permute.xlu1 %40 }
  0x81   :  { %v46_v26 = vpop.permute.xlu0 %45 }
  0x83   :  { %v36_v16 = vpop.permute.xlu1 %35 }
  0x85   :  { %v177_v7 = vpop.permute.xlu0 %176 }
  0xc6   :  { %v280_v15 = vpop.f32.mrf.mxu0 }
  0xc7   :  { %v138_v17 = vadd.f32 %v280_v15, %v41_v13 }
  0xc8   :  { %v132_v19 = vpop.f32.mrf.mxu0 }
  0xc9   :  { %v152_v20 = vmax.f32 %v138_v17, 0.0  ;;  %v133_v21 = vadd.f32 %v132_v19, %v36_v16 }
  0xca   :  { %v283_v22 = vpop.f32.mrf.mxu0 }
  0xcb   :  { %v157_v23 = vmul.f32 %v155_v18, %v152_v20  ;;  %v151_v24 = vmax.f32 %v133_v21, 0.0  ;;  %v148_v25 = vadd.f32 %v283_v22, %v51_v14 }
  0xcc   :  { %v142_v27 = vpop.f32.mrf.mxu0 }
  0xcd   :  { %v161_v28 = vmax.f32 %v157_v23, -2.0  ;;  %v156_v29 = vmul.f32 %v155_v18, %v151_v24  ;;  %v154_v30 = vmax.f32 %v148_v25, 0.0  ;;  %v143_v31 = vadd.f32 %v142_v27, %v46_v26 }
  0xcf   :  { %v165_v32 = vmin.f32 %v161_v28, 1.0  ;;  %v160_v33 = vmax.f32 %v156_v29, -2.0  ;;  %v159_v34 = vmul.f32 %v155_v18, %v154_v30  ;;  %v153_v35 = vmax.f32 %v143_v31, 0.0 }
  0xd1   :  { %v164_v36 = vmin.f32 %v160_v33, 1.0  ;;  %v163_v37 = vmax.f32 %v159_v34, -2.0  ;;  %v158_v38 = vmul.f32 %v155_v18, %v153_v35  ;;  %v305_v39 = vcvt.f32.s32 %v165_v32 }
  0xd2   :  { %v308_v55 = vand.u32 2147483648, %v165_v32  ;;  %v303_v60 = vand.u32 2147483647, %v165_v32 }
  0xd3   :  { %v167_v40 = vmin.f32 %v163_v37, 1.0  ;;  %v162_v41 = vmax.f32 %v158_v38, -2.0  ;;  %v297_v42 = vcvt.f32.s32 %v164_v36  ;;  %v306_v45 = vcvt.s32.f32 %v305_v39 }
  0xd4   :  { %v300_v0 = vand.u32 2147483648, %v164_v36  ;;  %v295_v1 = vand.u32 2147483647, %v164_v36  ;;  %vm304_vm4 = vcmp.lt.f32.partialorder %v303_v60, 8388608.0 }
  0xd5   :  { %v166_v43 = vmin.f32 %v162_v41, 1.0  ;;  %v321_v44 = vcvt.f32.s32 %v167_v40  ;;  %v298_v48 = vcvt.s32.f32 %v297_v42  ;;  %v319_v49 = vand.u32 2147483647, %v167_v40 }
  0xd6   :  { %v324_v51 = vand.u32 2147483648, %v167_v40  ;;  %v307_v53 = vand.u32 2147483647, %v306_v45  ;;  %vm296_vm5 = vcmp.lt.f32.partialorder %v295_v1, 8388608.0 }
  0xd7   :  { %v322_v46 = vcvt.s32.f32 %v321_v44  ;;  %v313_v47 = vcvt.f32.s32 %v166_v43  ;;  %v311_v54 = vand.u32 2147483647, %v166_v43  ;;  %v316_v58 = vand.u32 2147483648, %v166_v43 }
  0xd8   :  { %v299_v59 = vand.u32 2147483647, %v298_v48  ;;  %vm320_vm2 = vcmp.lt.f32.partialorder %v319_v49, 8388608.0  ;;  %v309_v63 = vor.u32 %v308_v55, %v307_v53 }
  0xd9   :  { %v323_v50 = vand.u32 2147483647, %v322_v46  ;;  %v314_v52 = vcvt.s32.f32 %v313_v47  ;;  %vm312_vm3 = vcmp.lt.f32.partialorder %v311_v54, 8388608.0 }
  0xda   :  { %v301_v3 = vor.u32 %v300_v0, %v299_v59  ;;  %v310_v4 = vsel %vm304_vm4, %v309_v63, %v165_v32 }
  0xdb   :  { %v325_v56 = vor.u32 %v324_v51, %v323_v50  ;;  %v315_v57 = vand.u32 2147483647, %v314_v52 }
  0xdc   :  { %v302_v6 = vsel %vm296_vm5, %v301_v3, %v164_v36 }
  0xdd   :  { %v326_v61 = vsel %vm320_vm2, %v325_v56, %v167_v40  ;;  %v317_v62 = vor.u32 %v316_v58, %v315_v57 }
  0xde   :  { %285 = vmatpush3.msra.mxu1 %v326_v61 }
  0xdf   :  { %286 = vmatprep.subr.mxu1 %v333_v12  ;;  %v318_v2 = vsel %vm312_vm3, %v317_v62, %v166_v43 }
  0xe0   :  { %287 = vmatpush3.msra.mxu1 %v318_v2 }
  0xe1   :  { %288 = vmatprep.subr.mxu1 %v333_v12 }
  0xe2   :  { %289 = vmatpush3.msra.mxu1 %v310_v4 }
  0xe3   :  { %290 = vmatprep.subr.mxu1 %v333_v12 }
  0xe4   :  { %291 = vmatpush3.msra.mxu1 %v302_v6 }
  0xe5   :  { %293 = vmatmul.mubr.msk.f32.vlgmr.msra.gmra.mxu1 %vm179_vm6, %v172_v5 }
 0x1a5   :  { %v249_v8 = vpop.f32.mrf.mxu1 }
 0x1a6   :  { %v250_v9 = vadd.f32 %v249_v8, %v177_v7 }
 0x1a7   :  { %v294_v10 = vpop.f32.mrf.mxu1 }
 0x1a8   :  { %253 = vst [vmem:[%s427_s6] sm:$0xff] %v250_v9 }

</bundles_post_ra>
